<compile_context>
chip_gen: v7x
topology: tpu7x:2x2x1
jax: 0.10.0
libtpu: 0.0.40
codegen_flags: <defaults>
</compile_context>

<pallas_src>
import functools

import jax
import jax.numpy as jnp
from jax.experimental import pallas as pl
from jax.experimental.pallas import tpu as pltpu


# ---------------------------------------------------------------------------
# helpers
# ---------------------------------------------------------------------------
def _round_up(x, m):
    return (x + m - 1) // m * m


def _gelu_tanh(y):
    c = 0.7978845608028654  # sqrt(2/pi)
    return 0.5 * y * (1.0 + jnp.tanh(c * (y + 0.044715 * y * y * y)))


@functools.lru_cache(maxsize=None)
def _weight_budget_bytes():
    """Per-buffer weight-block budget: bigger resident panels on 128MiB-VMEM chips."""
    try:
        cap = getattr(pltpu.get_tpu_info(), "vmem_capacity_bytes", 64 * 1024 * 1024)
    except Exception:
        cap = 64 * 1024 * 1024
    return (16 if cap >= 100 * 1024 * 1024 else 8) * 1024 * 1024


def _choose_tn(Np):
    if Np >= 256:
        for t in (1024, 512, 256, 128):
            # keep >= 2 blocks along N so both v7x TensorCores get parallel work
            if Np % t == 0 and 2 * t <= Np:
                return t
    return Np


def _choose_tk(K, tn, budget):
    max_tk = max(128, (budget // (2 * tn)) // 128 * 128)
    if K <= max_tk:
        return K, K                       # whole K panel resident, no padding
    Kp = _round_up(K, 128)
    tk = 128
    t = max_tk
    while t >= 128:
        if Kp % t == 0:
            tk = t
            break
        t -= 128
    return tk, Kp


# ---------------------------------------------------------------------------
# Pallas kernels
# ---------------------------------------------------------------------------
def _gemm_bias_act_kernel(x_ref, w_ref, b_ref, o_ref, acc_ref, *, act):
    """acc += x @ w (bf16 -> f32); last k-step: + bias, activation, store."""
    @pl.when(pl.program_id(2) == 0)
    def _():
        acc_ref[...] = jnp.zeros_like(acc_ref)

    acc_ref[...] += jnp.dot(x_ref[...], w_ref[...],
                            preferred_element_type=jnp.float32)

    @pl.when(pl.program_id(2) == pl.num_programs(2) - 1)
    def _():
        y = acc_ref[...] + b_ref[...]
        if act == "gelu":
            y = _gelu_tanh(y)
        elif act == "sigmoid":
            # exact sigmoid; only used for the tiny final 1x1 conv
            y = 1.0 / (1.0 + jnp.exp(-y))
        o_ref[...] = y.astype(o_ref.dtype)


def _se_mlp_kernel(p_ref, w1_ref, b1_ref, w2_ref, b2_ref, o_ref):
    """SELayer MLP fused in one call: sigmoid(gelu(p @ w1 + b1) @ w2 + b2)."""
    z = jnp.dot(p_ref[...], w1_ref[...],
                preferred_element_type=jnp.float32) + b1_ref[...]
    z = _gelu_tanh(z)
    g = jnp.dot(z.astype(w2_ref.dtype), w2_ref[...],
                preferred_element_type=jnp.float32) + b2_ref[...]
    o_ref[...] = pl.reciprocal(1.0 + jnp.exp(-g), approx=True)


# ---------------------------------------------------------------------------
# fused GEMM wrappers (bias + activation, BN already folded into weights)
# ---------------------------------------------------------------------------
_VMEM_LIMIT = 48 * 1024 * 1024


def fused_matmul(x, w, b, n, *, act="none", out_dtype=jnp.bfloat16):
    """out[:M, :n] = act(x @ w + b); w (K, Np) bf16, b (1, Np) f32."""
    M, K = x.shape
    Kw, Np = w.shape
    assert K == Kw, (K, Kw)
    x = x.astype(jnp.bfloat16)

    Mp = _round_up(M, 8)
    if Mp != M:
        x = jnp.pad(x, ((0, Mp - M), (0, 0)))

    tn = _choose_tn(Np)
    tk, Kp = _choose_tk(K, tn, _weight_budget_bytes())
    if Kp != K:
        x = jnp.pad(x, ((0, 0), (0, Kp - K)))
        w = jnp.pad(w, ((0, Kp - K), (0, 0)))
    tm = Mp                                           # M is small in this decoder

    out = pl.pallas_call(
        functools.partial(_gemm_bias_act_kernel, act=act),
        out_shape=jax.ShapeDtypeStruct((Mp, Np), out_dtype),
        grid_spec=pltpu.PrefetchScalarGridSpec(
            num_scalar_prefetch=0,
            grid=(Mp // tm, Np // tn, Kp // tk),
            in_specs=[
                pl.BlockSpec((tm, tk), lambda i, j, k: (i, k)),
                pl.BlockSpec((tk, tn), lambda i, j, k: (k, j)),
                pl.BlockSpec((1, tn), lambda i, j, k: (0, j)),
            ],
            out_specs=pl.BlockSpec((tm, tn), lambda i, j, k: (i, j)),
            scratch_shapes=[pltpu.VMEM((tm, tn), jnp.float32)],
        ),
        compiler_params=pltpu.CompilerParams(
            dimension_semantics=("parallel", "parallel", "arbitrary"),
            vmem_limit_bytes=_VMEM_LIMIT),
    )(x, w, b)
    return out[:M, :n]


def fused_matmul_grouped(xg, wg, b, n, *, act="none", out_dtype=jnp.bfloat16):
    """Per-group GEMM (shared bias): out[g, :M, :n] = act(xg[g] @ wg[g] + b)."""
    G, M, K = xg.shape
    Gw, Kw, Np = wg.shape
    assert G == Gw and K == Kw, (xg.shape, wg.shape)
    xg = xg.astype(jnp.bfloat16)

    Mp = _round_up(M, 8)
    if Mp != M:
        xg = jnp.pad(xg, ((0, 0), (0, Mp - M), (0, 0)))

    tn = _choose_tn(Np)
    tk, Kp = _choose_tk(K, tn, _weight_budget_bytes())
    if Kp != K:
        xg = jnp.pad(xg, ((0, 0), (0, 0), (0, Kp - K)))
        wg = jnp.pad(wg, ((0, 0), (0, Kp - K), (0, 0)))

    out = pl.pallas_call(
        functools.partial(_gemm_bias_act_kernel, act=act),
        out_shape=jax.ShapeDtypeStruct((G, Mp, Np), out_dtype),
        grid_spec=pltpu.PrefetchScalarGridSpec(
            num_scalar_prefetch=0,
            grid=(G, Np // tn, Kp // tk),
            in_specs=[
                pl.BlockSpec((pl.Squeezed(), Mp, tk), lambda g, j, k: (g, 0, k)),
                pl.BlockSpec((pl.Squeezed(), tk, tn), lambda g, j, k: (g, k, j)),
                pl.BlockSpec((1, tn), lambda g, j, k: (0, j)),
            ],
            out_specs=pl.BlockSpec((pl.Squeezed(), Mp, tn),
                                   lambda g, j, k: (g, 0, j)),
            scratch_shapes=[pltpu.VMEM((Mp, tn), jnp.float32)],
        ),
        compiler_params=pltpu.CompilerParams(
            dimension_semantics=("parallel", "parallel", "arbitrary"),
            vmem_limit_bytes=_VMEM_LIMIT),
    )(xg, wg, b)
    return out[:, :M, :n]


def se_gates(pooled_f32, p):
    """SELayer MLP: (B, C) pooled -> (B, C) gates, one fused Pallas call."""
    B, C = pooled_f32.shape
    Mp = _round_up(B, 8)
    x = jnp.pad(pooled_f32.astype(jnp.bfloat16), ((0, Mp - B), (0, 0)))
    vspec = pl.BlockSpec(memory_space=pltpu.MemorySpace.VMEM)
    out = pl.pallas_call(
        _se_mlp_kernel,
        out_shape=jax.ShapeDtypeStruct((Mp, p["w2"].shape[1]), jnp.float32),
        in_specs=[vspec] * 5,
        out_specs=vspec,
    )(x, p["w1"], p["b1"], p["w2"], p["b2"])
    return out[:B, :p["n"]]


# ---------------------------------------------------------------------------
# conv / conv-transpose wrappers (patch gather in bf16, GEMM in Pallas)
# ---------------------------------------------------------------------------
# ConvTranspose2d(k=4, s=2, p=1): output parity py draws from input offsets
# _OFFSETS[py], using kernel row _OFF_TO_K[py][offset] (same along x).
_OFFSETS = {0: (-1, 0), 1: (0, 1)}
_OFF_TO_K = {0: {-1: 3, 0: 1}, 1: {0: 2, 1: 0}}


def _im2col_3x3(x_nhwc):
    """3x3 window, pad=1, stride=1 -> (B*H*W, 9*C), tap-major column order."""
    B, H, W, C = x_nhwc.shape
    xp = jnp.pad(x_nhwc, ((0, 0), (1, 1), (1, 1), (0, 0)))
    taps = [xp[:, dy:dy + H, dx:dx + W, :] for dy in range(3) for dx in range(3)]
    return jnp.concatenate(taps, axis=-1).reshape(B * H * W, 9 * C)


def _parity_patches(x_nhwc):
    """(4, B*H*W, 4*C); parity p=2*py+px uses offsets _OFFSETS[py] x _OFFSETS[px]."""
    B, H, W, C = x_nhwc.shape
    xp = jnp.pad(x_nhwc, ((0, 0), (1, 1), (1, 1), (0, 0)))
    groups = []
    for py in (0, 1):
        for px in (0, 1):
            taps = [xp[:, 1 + dy:1 + dy + H, 1 + dx:1 + dx + W, :]
                    for dy in _OFFSETS[py] for dx in _OFFSETS[px]]
            groups.append(jnp.concatenate(taps, axis=-1).reshape(B * H * W, 4 * C))
    return jnp.stack(groups, axis=0)


def conv3x3_bn_gelu(x_nhwc, packed):
    B, H, W, _ = x_nhwc.shape
    y = fused_matmul(_im2col_3x3(x_nhwc.astype(jnp.bfloat16)),
                     packed["w"], packed["b"], packed["n"], act="gelu")
    return y.reshape(B, H, W, packed["n"])


def conv_transpose4x4_s2_bn_gelu(x_nhwc, packed):
    B, H, W, C = x_nhwc.shape
    cout = packed["n"]
    x_nhwc = x_nhwc.astype(jnp.bfloat16)
    if H == 1 and W == 1:
        # 1x1 input: all non-centre taps multiply zero padding -> single GEMM
        # over K = Cin, streaming only 4*Cin*Cout real weights.
        y = fused_matmul(x_nhwc.reshape(B, C), packed["w11"], packed["b11"],
                         4 * cout, act="gelu")
        return y.reshape(B, 2, 2, cout)
    y = fused_matmul_grouped(_parity_patches(x_nhwc), packed["wp"], packed["b"],
                             cout, act="gelu")                  # (4, B*H*W, cout)
    y = y.reshape(2, 2, B, H, W, cout)
    y = jnp.transpose(y, (2, 3, 0, 4, 1, 5))                    # (B, H, py, W, px, c)
    return y.reshape(B, 2 * H, 2 * W, cout)


def conv1x1_sigmoid(x_nhwc, packed):
    B, H, W, C = x_nhwc.shape
    y = fused_matmul(x_nhwc.reshape(B * H * W, C), packed["w"], packed["b"],
                     packed["n"], act="sigmoid", out_dtype=jnp.float32)
    return y.reshape(B, H, W, packed["n"])


# ---------------------------------------------------------------------------
# parameter preparation (fold BN + conv bias once; pad N to 128)
# ---------------------------------------------------------------------------
def _fold_bn(bn, conv_bias, eps=1e-5):
    s = bn["gamma"] * jax.lax.rsqrt(bn["var"] + eps)
    b = bn["beta"] + s * (conv_bias - bn["mean"])
    return s, b


def _pack_dense(wg, bias):
    K, N = wg.shape
    Np = _round_up(N, 128)
    w = jnp.pad(wg.astype(jnp.bfloat16), ((0, 0), (0, Np - N)))
    b = jnp.pad(bias.astype(jnp.float32), (0, Np - N)).reshape(1, Np)
    return {"w": w, "b": b, "n": N}


def prep_conv3x3(w_oihw, conv_b, bn):
    s, b = _fold_bn(bn, conv_b)
    w_eff = w_oihw * s[:, None, None, None]
    cout, cin = w_oihw.shape[0], w_oihw.shape[1]
    wg = jnp.transpose(w_eff, (2, 3, 1, 0)).reshape(9 * cin, cout)
    return _pack_dense(wg, b)


def prep_conv1x1(w_oihw, conv_b):
    cout, cin = w_oihw.shape[:2]
    return _pack_dense(w_oihw.reshape(cout, cin).T, conv_b)


def prep_se(fc1, fc2):
    (w1, b1), (w2, b2) = fc1, fc2
    return {"w1": jnp.asarray(w1).T.astype(jnp.bfloat16),
            "b1": jnp.asarray(b1, jnp.float32).reshape(1, -1),
            "w2": jnp.asarray(w2).T.astype(jnp.bfloat16),
            "b2": jnp.asarray(b2, jnp.float32).reshape(1, -1),
            "n": w2.shape[0]}


def prep_convT(w_iokk, conv_b, bn):
    """ConvT(k=4,s=2,p=1)+BN -> (a) per-parity GEMM weights (4, 4*Cin, Np) with
    only the 16 real (tap,parity) blocks, (b) a 1x1-input fast path (Cin, 4*Cout)
    keeping only the centre taps."""
    cin, cout = w_iokk.shape[0], w_iokk.shape[1]
    s, b_eff = _fold_bn(bn, conv_b)
    w_eff = w_iokk * s[None, :, None, None]                     # (cin, cout, 4, 4)
    Np = _round_up(cout, 128)

    parity_w, w11_cols = [], []
    for py in (0, 1):
        for px in (0, 1):
            blocks = []
            for dy in _OFFSETS[py]:
                for dx in _OFFSETS[px]:
                    ky, kx = _OFF_TO_K[py][dy], _OFF_TO_K[px][dx]
                    blocks.append(w_eff[:, :, ky, kx])          # (cin, cout)
            parity_w.append(jnp.concatenate(blocks, axis=0))    # (4*cin, cout)
            w11_cols.append(w_eff[:, :, _OFF_TO_K[py][0], _OFF_TO_K[px][0]])
    wp = jnp.pad(jnp.stack(parity_w, 0).astype(jnp.bfloat16),
                 ((0, 0), (0, 0), (0, Np - cout)))               # (4, 4*cin, Np)
    b = jnp.pad(b_eff.astype(jnp.float32), (0, Np - cout)).reshape(1, Np)
    w11 = jnp.concatenate(w11_cols, axis=1).astype(jnp.bfloat16)  # (cin, 4*cout)
    b11 = jnp.tile(b_eff.astype(jnp.float32), 4).reshape(1, 4 * cout)
    return {"wp": wp, "b": b, "w11": w11, "b11": b11, "n": cout}


def prepare_decoder_params(raw):
    prepared = {"ups": [], "decs": []}
    for up in raw["ups"]:
        prepared["ups"].append(prep_convT(up["w"], up["b"], up["bn"]))
    for dec in raw["decs"]:
        prepared["decs"].append({
            "c1": prep_conv3x3(dec["conv1_w"], dec["conv1_b"], dec["bn1"]),
            "c2": prep_conv3x3(dec["conv2_w"], dec["conv2_b"], dec["bn2"]),
            "se": prep_se(dec["fc1"], dec["fc2"]),
        })
    prepared["out"] = prep_conv1x1(raw["out"]["w"], raw["out"]["b"])
    return prepared


# ---------------------------------------------------------------------------
# deterministic synthetic Decoder parameters (PyTorch layouts)
# ---------------------------------------------------------------------------
def init_decoder_params(bottleneck_ch, skip_chs, out_channels, seed=0):
    base = jax.random.PRNGKey(seed)
    ctr = [0]

    def nk():
        ctr[0] += 1
        return jax.random.fold_in(base, ctr[0])

    def conv_w(cout, cin, kh, kw):
        fan_in = cin * kh * kw
        return (jax.random.normal(nk(), (cout, cin, kh, kw), jnp.float32)
                * jnp.sqrt(2.0 / fan_in))

    def convT_w(cin, cout, k):
        fan_in = cin * k * k
        return (jax.random.normal(nk(), (cin, cout, k, k), jnp.float32)
                * jnp.sqrt(2.0 / fan_in))

    def vec(c):
        return 0.05 * jax.random.normal(nk(), (c,), jnp.float32)

    def bn_p(c):
        return {"gamma": 1.0 + 0.1 * jax.random.normal(nk(), (c,), jnp.float32),
                "beta": vec(c), "mean": vec(c),
                "var": 1.0 + 0.1 * jax.random.uniform(nk(), (c,), jnp.float32)}

    def linear_p(cin, cout):
        lim = 1.0 / (cin ** 0.5)
        w = jax.random.uniform(nk(), (cout, cin), jnp.float32, -lim, lim)
        b = jax.random.uniform(nk(), (cout,), jnp.float32, -lim, lim)
        return w, b

    up_cfg = [(bottleneck_ch, 1024), (1024, 512), (512, 256), (256, 128)]
    dec_cfg = [(1024 + skip_chs[0], 1024), (512 + skip_chs[1], 512),
               (256 + skip_chs[2], 256), (128 + skip_chs[3], 64)]

    params = {"ups": [], "decs": []}
    for cin, cout in up_cfg:
        params["ups"].append({"w": convT_w(cin, cout, 4), "b": vec(cout),
                              "bn": bn_p(cout)})
    for cin, cout in dec_cfg:
        red = max(cout // 16, 1)
        params["decs"].append({
            "conv1_w": conv_w(cout, cin, 3, 3), "conv1_b": vec(cout), "bn1": bn_p(cout),
            "conv2_w": conv_w(cout, cout, 3, 3), "conv2_b": vec(cout), "bn2": bn_p(cout),
            "fc1": linear_p(cout, red),
            "fc2": linear_p(red, cout),
        })
    params["out"] = {"w": conv_w(out_channels, 64, 1, 1), "b": vec(out_channels)}
    return params


# ---------------------------------------------------------------------------
# forward pass (matches Decoder.forward)
# ---------------------------------------------------------------------------
def conv_block(x, p):
    h = conv3x3_bn_gelu(x, p["c1"])
    h = conv3x3_bn_gelu(h, p["c2"])
    pooled = jnp.mean(h.astype(jnp.float32), axis=(1, 2))        # (B, C)
    g = se_gates(pooled, p["se"])                                # (B, C) gates
    return h * g.astype(h.dtype)[:, None, None, :]               # XLA-fused gating


def decoder_forward(bottleneck_nchw, skips_nchw, prepared):
    to_nhwc = lambda t: jnp.transpose(t, (0, 2, 3, 1))
    d = to_nhwc(bottleneck_nchw).astype(jnp.bfloat16)
    skips = [to_nhwc(s).astype(jnp.bfloat16) for s in skips_nchw]

    for up_p, dec_p, skip in zip(prepared["ups"], prepared["decs"], skips):
        u = conv_transpose4x4_s2_bn_gelu(d, up_p)
        d = conv_block(jnp.concatenate([u, skip], axis=-1), dec_p)

    out = conv1x1_sigmoid(d, prepared["out"])                    # f32 NHWC
    return jnp.transpose(out, (0, 3, 1, 2))                      # -> NCHW


# ---------------------------------------------------------------------------
# ConvTranspose lowering self-test against an lhs-dilated lax convolution
# ---------------------------------------------------------------------------
def _convT_reference(x_nhwc_f32, w_iokk, conv_b, bn):
    s, b = _fold_bn(bn, conv_b)
    w_eff = w_iokk * s[None, :, None, None]                      # (cin, cout, 4, 4)
    rhs = jnp.transpose(w_eff, (2, 3, 0, 1))[::-1, ::-1, :, :]   # flipped HWIO
    y = jax.lax.conv_general_dilated(
        x_nhwc_f32, rhs, window_strides=(1, 1), padding=((2, 2), (2, 2)),
        lhs_dilation=(2, 2), rhs_dilation=(1, 1),
        dimension_numbers=("NHWC", "HWIO", "NHWC"))
    return _gelu_tanh(y + b[None, None, None, :])


def _self_test_convT():
    k1, k2, k3 = jax.random.split(jax.random.PRNGKey(42), 3)
    cin, cout, B, H, W = 256, 128, 2, 3, 3
    w = jax.random.normal(k1, (cin, cout, 4, 4), jnp.float32) * (2.0 / (cin * 16)) ** 0.5
    cb = 0.05 * jax.random.normal(k2, (cout,), jnp.float32)
    bn = {"gamma": jnp.ones((cout,), jnp.float32), "beta": jnp.zeros((cout,), jnp.float32),
          "mean": jnp.zeros((cout,), jnp.float32), "var": jnp.ones((cout,), jnp.float32)}
    x = jax.random.normal(k3, (B, H, W, cin), jnp.float32)
    x = x.astype(jnp.bfloat16).astype(jnp.float32)
    packed = prep_convT(w, cb, bn)

    got = conv_transpose4x4_s2_bn_gelu(x.astype(jnp.bfloat16), packed).astype(jnp.float32)
    want = _convT_reference(x, w, cb, bn)
    err = float(jnp.max(jnp.abs(got - want)))
    assert err < 0.06, f"ConvT general-path mismatch: max abs err {err}"

    x1 = x[:, :1, :1, :]
    got1 = conv_transpose4x4_s2_bn_gelu(x1.astype(jnp.bfloat16), packed).astype(jnp.float32)
    want1 = _convT_reference(x1, w, cb, bn)
    err1 = float(jnp.max(jnp.abs(got1 - want1)))
    assert err1 < 0.06, f"ConvT 1x1-path mismatch: max abs err {err1}"


# ---------------------------------------------------------------------------
if __name__ == "__main__":
    _self_test_convT()

    key = jax.random.PRNGKey(0)
    B = 2
    bottleneck_ch, skip_chs, out_channels = 2048, [1024, 512, 256, 64], 1

    kb, k0, k1, k2, k3 = jax.random.split(key, 5)
    bottleneck = jax.random.normal(kb, (B, bottleneck_ch, 1, 1), jnp.float32)
    skips = [
        jax.random.normal(k0, (B, skip_chs[0], 2, 2), jnp.float32),
        jax.random.normal(k1, (B, skip_chs[1], 4, 4), jnp.float32),
        jax.random.normal(k2, (B, skip_chs[2], 8, 8), jnp.float32),
        jax.random.normal(k3, (B, skip_chs[3], 16, 16), jnp.float32),
    ]

    raw = init_decoder_params(bottleneck_ch, skip_chs, out_channels, seed=0)
    prepared = prepare_decoder_params(raw)

    out = decoder_forward(bottleneck, skips, prepared)
    jax.block_until_ready(out)

    assert out.shape == (B, out_channels, 16, 16), out.shape
    assert bool(jnp.all(jnp.isfinite(out)))
    assert bool(jnp.all((out >= 0.0) & (out <= 1.0)))   # sigmoid output range

    print("KERNEL_OK")
</pallas_src>

<mosaic_0001>
module attributes {stable_mosaic.version = 11 : i64} {
  func.func @_gemm_bias_act_kernel(%arg0: i32, %arg1: i32, %arg2: i32, %arg3: memref<1x24x1024xbf16, #tpu.memory_space<vmem>>, %arg4: memref<1x1024x128xbf16, #tpu.memory_space<vmem>>, %arg5: memref<1x128xf32, #tpu.memory_space<vmem>>, %arg6: memref<1x24x128xbf16, #tpu.memory_space<vmem>>, %arg7: memref<24x128xf32, #tpu.memory_space<vmem>>) attributes {dimension_semantics = [#tpu.dimension_semantics<parallel>, #tpu.dimension_semantics<parallel>, #tpu.dimension_semantics<arbitrary>], iteration_bounds = array<i64: 4, 1, 1>, scalar_prefetch = 0 : i64, scratch_operands = 1 : i64, tpu.core_type = #tpu.core_type<tc>, window_params = [{transform_indices = @transform_0, window_bounds = array<i64: 1, 24, 1024>}, {transform_indices = @transform_1, window_bounds = array<i64: 1, 1024, 128>}, {transform_indices = @transform_2, window_bounds = array<i64: 1, 128>}, {transform_indices = @transform_3, window_bounds = array<i64: 1, 24, 128>}]} {
    %c0_i32 = arith.constant 0 : i32
    %0 = arith.cmpi eq, %arg2, %c0_i32 : i32
    %1 = arith.extui %0 : i1 to i32
    %c0_i32_0 = arith.constant 0 : i32
    %2 = arith.cmpi ne, %1, %c0_i32_0 : i32
    scf.if %2 {
      %cst_12 = arith.constant 0.000000e+00 : f32
      %14 = vector.broadcast %cst_12 : f32 to vector<24x128xf32>
      %c0_13 = arith.constant 0 : index
      %c0_14 = arith.constant 0 : index
      %15 = vector.load %arg7[%c0_13, %c0_14] : memref<24x128xf32, #tpu.memory_space<vmem>>, vector<24x128xf32>
      tpu.vector_store %arg7[%c0_13, %c0_14], %14 {strides = array<i32>} : memref<24x128xf32, #tpu.memory_space<vmem>>, vector<24x128xf32>,
    } else {
    }
    %c0 = arith.constant 0 : index
    %c0_1 = arith.constant 0 : index
    %3 = vector.load %arg7[%c0, %c0_1] : memref<24x128xf32, #tpu.memory_space<vmem>>, vector<24x128xf32>
    %c0_2 = arith.constant 0 : index
    %c0_3 = arith.constant 0 : index
    %c0_4 = arith.constant 0 : index
    %4 = vector.load %arg3[%c0_2, %c0_3, %c0_4] : memref<1x24x1024xbf16, #tpu.memory_space<vmem>>, vector<1x24x1024xbf16>
    %5 = vector.shape_cast %4 : vector<1x24x1024xbf16> to vector<24x1024xbf16>
    %c0_5 = arith.constant 0 : index
    %c0_6 = arith.constant 0 : index
    %c0_7 = arith.constant 0 : index
    %6 = vector.load %arg4[%c0_5, %c0_6, %c0_7] : memref<1x1024x128xbf16, #tpu.memory_space<vmem>>, vector<1x1024x128xbf16>
    %7 = vector.shape_cast %6 : vector<1x1024x128xbf16> to vector<1024x128xbf16>
    %cst = arith.constant dense<0.000000e+00> : vector<24x128xf32>
    %8 = tpu.matmul %5, %7, %cst {dimension_numbers = #tpu.dot_dimension_numbers<[1], [0], [0], [1], [0, 0, 1, 1], [], []>} : vector<24x1024xbf16>, vector<1024x128xbf16>, vector<24x128xf32> -> vector<24x128xf32>
    %9 = arith.addf %3, %8 : vector<24x128xf32>
    %c0_8 = arith.constant 0 : index
    %c0_9 = arith.constant 0 : index
    %10 = vector.load %arg7[%c0_8, %c0_9] : memref<24x128xf32, #tpu.memory_space<vmem>>, vector<24x128xf32>
    tpu.vector_store %arg7[%c0_8, %c0_9], %9 {strides = array<i32>} : memref<24x128xf32, #tpu.memory_space<vmem>>, vector<24x128xf32>,
    %c0_i32_10 = arith.constant 0 : i32
    %11 = arith.cmpi eq, %arg2, %c0_i32_10 : i32
    %12 = arith.extui %11 : i1 to i32
    %c0_i32_11 = arith.constant 0 : i32
    %13 = arith.cmpi ne, %12, %c0_i32_11 : i32
    scf.if %13 {
      %c0_12 = arith.constant 0 : index
      %c0_13 = arith.constant 0 : index
      %14 = vector.load %arg7[%c0_12, %c0_13] : memref<24x128xf32, #tpu.memory_space<vmem>>, vector<24x128xf32>
      %c0_14 = arith.constant 0 : index
      %c0_15 = arith.constant 0 : index
      %15 = vector.load %arg5[%c0_14, %c0_15] : memref<1x128xf32, #tpu.memory_space<vmem>>, vector<1x128xf32>
      %16 = vector.broadcast %15 : vector<1x128xf32> to vector<24x128xf32>
      %17 = arith.addf %14, %16 : vector<24x128xf32>
      %cst_16 = arith.constant 5.000000e-01 : f32
      %18 = vector.broadcast %cst_16 : f32 to vector<24x128xf32>
      %19 = arith.mulf %18, %17 : vector<24x128xf32>
      %cst_17 = arith.constant 4.471500e-02 : f32
      %20 = vector.broadcast %cst_17 : f32 to vector<24x128xf32>
      %21 = arith.mulf %20, %17 : vector<24x128xf32>
      %22 = arith.mulf %21, %17 : vector<24x128xf32>
      %23 = arith.mulf %22, %17 : vector<24x128xf32>
      %24 = arith.addf %17, %23 : vector<24x128xf32>
      %cst_18 = arith.constant 0.797884583 : f32
      %25 = vector.broadcast %cst_18 : f32 to vector<24x128xf32>
      %26 = arith.mulf %25, %24 : vector<24x128xf32>
      %27 = math.tanh %26 : vector<24x128xf32>
      %cst_19 = arith.constant 1.000000e+00 : f32
      %28 = vector.broadcast %cst_19 : f32 to vector<24x128xf32>
      %29 = arith.addf %28, %27 : vector<24x128xf32>
      %30 = arith.mulf %19, %29 : vector<24x128xf32>
      %31 = arith.truncf %30 : vector<24x128xf32> to vector<24x128xbf16>
      %c0_20 = arith.constant 0 : index
      %c0_21 = arith.constant 0 : index
      %c0_22 = arith.constant 0 : index
      %32 = vector.load %arg6[%c0_20, %c0_21, %c0_22] : memref<1x24x128xbf16, #tpu.memory_space<vmem>>, vector<1x24x128xbf16>
      %33 = vector.shape_cast %32 : vector<1x24x128xbf16> to vector<24x128xbf16>
      %34 = vector.shape_cast %31 : vector<24x128xbf16> to vector<1x24x128xbf16>
      tpu.vector_store %arg6[%c0_20, %c0_21, %c0_22], %34 {strides = array<i32>} : memref<1x24x128xbf16, #tpu.memory_space<vmem>>, vector<1x24x128xbf16>,
    } else {
    }
    return
  }
  func.func @transform_0(%arg0: i32, %arg1: i32, %arg2: i32) -> (i32, i32, i32) {
    %c0_i32 = arith.constant 0 : i32
    %c0_i32_0 = arith.constant 0 : i32
    return %arg0, %c0_i32, %arg2 : i32, i32, i32
  }
  func.func @transform_1(%arg0: i32, %arg1: i32, %arg2: i32) -> (i32, i32, i32) {
    %c0_i32 = arith.constant 0 : i32
    return %arg0, %arg2, %arg1 : i32, i32, i32
  }
  func.func @transform_2(%arg0: i32, %arg1: i32, %arg2: i32) -> (i32, i32) {
    %c0_i32 = arith.constant 0 : i32
    %c0_i32_0 = arith.constant 0 : i32
    return %c0_i32, %arg1 : i32, i32
  }
  func.func @transform_3(%arg0: i32, %arg1: i32, %arg2: i32) -> (i32, i32, i32) {
    %c0_i32 = arith.constant 0 : i32
    %c0_i32_0 = arith.constant 0 : i32
    return %arg0, %c0_i32, %arg1 : i32, i32, i32
  }
}

</mosaic_0001>

<bundles_post_ra>
// kernel: tpu_custom_call.1
= control target key start
LH: loop header
LB: loop body
LE: loop exit
PB: predicated region body
PF: predicated region fallthrough
CT: control target
= control target key end

     0   :  { %8 = vsyncpa [#allocation4], 0  ;;  %s2139_s0 = inlined_call_operand.hbm [shape: bf16[4,24,1024], index: 0, kind: input, shape index: {}]   ;;  %s2140_s1 = inlined_call_operand.hbm [shape: bf16[4,1024,128], index: 1, kind: input, shape index: {}]   ;;  %s2141_s2 = inlined_call_operand.vmem [shape: f32[1,128], index: 2, kind: input, shape index: {}]   ;;  %s2142_s3 = inlined_call_operand.hbm [shape: bf16[4,24,128], index: 3, kind: output, shape index: {}]  }
   0x1   :  { %10 = vsyncpa [#allocation4 + $0x1], 0 }
   0x2   :  { %11 = vsyncpa [#allocation7], 0 }
   0x3   :  { %13 = vsyncpa [#allocation7 + $0x1], 0 }
   0x4   :  { %14 = vsyncpa [#allocation5], 0 }
   0x5   :  { %16 = vsyncpa [#allocation5 + $0x1], 0  ;;  %s1832_s12 = smov 0   ;;  %s1834_s13 = smov 0  }
   0x6   :  { %s1836_s14 = smov 0   ;;  %s1838_s15 = smov 0  }
   0x7   :  { %s1840_s16 = smov 0   ;;  %s1842_s17 = smov 0  }
   0x8 LB: > { %s1280_s18 = sadd.s32 4294967295, %s1801_s17   ;;  %s1281_s19 = sadd.s32 4294967294, %s1801_s17   ;;  %s1801_s17 = sphi %s1842_s17, %s22_s17   ;;  %s1797_s16 = sphi %s1840_s16, %s2159_s16   ;;  %s1793_s15 = sphi %s1838_s15, %s2158_s15   ;;  %s1789_s14 = sphi %s1836_s14, %s2157_s14   ;;  %s1785_s13 = sphi %s1834_s13, %s2156_s13   ;;  %s1781_s12 = sphi %s1832_s12, %s2155_s12  }
   0x9   : > { %s41_s20 = sadd.s32 1, %s1797_s16  ;;  %s50_s21 = sadd.s32 1, %s1789_s14 }
   0xa   : > { %p43_p0 = scmp.ge.s32.totalorder %s41_s20, 4  ;;  %p57_p1 = scmp.ne.s32.totalorder %s1789_s14, %s1785_s13 }
   0xb   : > { %p58_p2 = scmp.eq.s32.totalorder %s1801_s17, 0  ;;  %p63_p3 = scmp.ne.s32.totalorder %s1785_s13, %s1781_s12 }
   0xc   : > { %s2161_s20 = smov (%p43_p0, %s41_s20), 0  ;;  %p64_p5 = scmp.eq.s32.totalorder %s1280_s18, 0 }
   0xd   : > { %p1873_p4 = por %p58_p2, %p57_p1  ;;  %s45_s23 = ssub.s32 %s1797_s16, %s2161_s20 }
   0xe   : > { %p145_p6 = scmp.eq.s32.totalorder %s1280_s18, 3  ;;  %p48_p7 = scmp.eq.s32.totalorder %s45_s23, 0 }
   0xf   : > { %p1879_p8 = por %p64_p5, %p63_p3  ;;  %p151_p10 = scmp.eq.s32.totalorder %s1281_s19, 3 }
  0x10   : > { %p1883_p9 = por %p145_p6, %p57_p1  ;;  %p1521_p12 = scmp.lt.s32.totalorder %s1801_s17, 4 }
  0x11   : > { %s2146_s24 = scalar_select %p1879_p8, 1, 0 }
  0x12   : > { %s2147_s25 = scalar_select %p1883_p9, 1, 0 }
  0x13   : > { %s1888_s26 = scalar_select %p48_p7, %s1789_s14, %s50_s21  }
  0x14   : > { %p1890_p11 = por %p151_p10, %p63_p3  ;;  %s1896_s28 = sand.u32 1, %s1789_s14  }
  0x15   : > { %s1499_s29 = smul.u32 96, %s1896_s28  ;;  %p1902_p13 = pnand %p1521_p12, %p1873_p4 }
  0x16   : > { %s2148_s27 = scalar_select %p1890_p11, 1, 0 }
  0x17   : > { %s1500_s30 = smul.u32 1536, %s1797_s16  ;;  %s181_s8 = scalar_lea.vmem [#allocation3], %s1499_s29 }
  0x18   : > { %s190_s9 = sshll.u32 %s181_s8, 4  ;;  %s178_s10 = scalar_lea.sflag [#allocation4], %s1896_s28  ;;  %s1911_s9 = int_to_ptr.vmem [resolvable:$true] %s190_s9 }
  0x19   : > { %s1909_s7 = scalar_lea.hbm %s2139_s0, %s1500_s30  ;;  %p1657_p2 = pneg %p1902_p13 }
  0x1a   : > { %s1655_s11 = scalar_lea.hbm %s1909_s7, 1536  ;;  %s1660_s21 = scalar_lea.hbm %s2139_s0, 6144 }
  0x1b   : > { %p1656_p1 = scmp.ne.s32.totalorder %s1909_s7, %s1655_s11  ;;  %p1661_p5 = scmp.lt.u32.totalorder %s1909_s7, %s2139_s0 }
  0x1c   : > { %p1662_p6 = scmp.lt.u32.totalorder %s1660_s21, %s1655_s11  ;;  %p1664_p10 = scmp.lt.u32.totalorder %s1655_s11, %s1909_s7 }
  0x1d   : > { %p1658_p3 = pnand %p1657_p2, %p1656_p1 }
  0x1e   : > { %p1663_p7 = por %p1662_p6, %p1661_p5 }
  0x1f   : > { %p1659_p4 = pneg %p1658_p3 }
  0x20   : > { %p1665_p12 = por %p1664_p10, %p1663_p7 }
  0x22   : > { %p1666_p0 = pnand %p1665_p12, %p1659_p4 }
  0x24   : > { %1669 = shalt.err (!%p1666_p0)
}
  0x25   : > { %s1670_s29 = scalar_lea.vmem %s1911_s9, 1536  ;;  %s1803_s30 = smov [#allocation3]  }
  0x26   : > { %p1671_p1 = scmp.ne.s32.totalorder %s1911_s9, %s1670_s29  ;;  %s1675_s5 = sshll.u32 %s1803_s30, 4  ;;  %s1676_s5 = int_to_ptr.vmem [resolvable:$false] %s1675_s5 }
  0x27   : > { %s1677_s6 = scalar_lea.vmem %s1676_s5, 3072  ;;  %p1678_p9 = scmp.lt.s32.totalorder %s1911_s9, %s1676_s5 }
  0x28   : > { %p1673_p3 = pnand %p1671_p1, %p1657_p2  ;;  %p1679_p5 = scmp.lt.s32.totalorder %s1677_s6, %s1670_s29 }
  0x2a   : > { %p1674_p11 = pneg %p1673_p3  ;;  %p1680_p6 = por %p1679_p5, %p1678_p9 }
  0x2c   : > { %p1681_p7 = pnand %p1680_p6, %p1674_p11 }
  0x2e   : > { %1684 = shalt.err (!%p1681_p7)
}
  0x2f   : > { %s1804_s8 = smov 512   ;;  %s1805_s11 = smov 32  }
  0x30   : > { %1513 = dma.hbm_to_vmem [thread:$0]  (!%p1902_p13), %s1909_s7, 1536, %s1911_s9, %s178_s10, %s1804_s8, %s1804_s8, %s1805_s11  }
  0x31   : > { %p222_p0 = scmp.lt.s32.totalorder %s1801_s17, 5  ;;  %s1286_s18 = sshll.u32 %s1896_s28, 9 }
  0x32   : > { %s1378_s19 = sshll.u32 %s1797_s16, 13  ;;  %p2150_p9 = scmp.ge.s32.totalorder %s1801_s17, 1 }
  0x33   : > { %s1954_s29 = scalar_lea.hbm %s2140_s1, %s1378_s19  ;;  %s204_s30 = scalar_lea.vmem [#allocation6], %s1286_s18 }
  0x34   : > { %p1947_p11 = pnand %p2150_p9, %p222_p0  ;;  %s214_s5 = sshll.u32 %s204_s30, 4  ;;  %s1956_s5 = int_to_ptr.vmem [resolvable:$true] %s214_s5 }
  0x35   : > { %s201_s7 = scalar_lea.sflag [#allocation7], %s1896_s28  ;;  %s1685_s9 = scalar_lea.hbm %s1954_s29, 8192 }
  0x36   : > { %p1686_p4 = scmp.ne.s32.totalorder %s1954_s29, %s1685_s9  ;;  %s1690_s8 = scalar_lea.hbm %s2140_s1, 32768 }
  0x37   : > { %p1691_p1 = scmp.lt.u32.totalorder %s1954_s29, %s2140_s1  ;;  %p1692_p3 = scmp.lt.u32.totalorder %s1690_s8, %s1685_s9 }
  0x38   : > { %p1688_p10 = pnand %p1686_p4, %p1657_p2  ;;  %p1694_p6 = scmp.lt.u32.totalorder %s1685_s9, %s1954_s29 }
  0x39   : > { %p1693_p5 = por %p1692_p3, %p1691_p1 }
  0x3a   : > { %p1689_p12 = pneg %p1688_p10 }
  0x3b   : > { %p1695_p7 = por %p1694_p6, %p1693_p5 }
  0x3d   : > { %p1696_p0 = pnand %p1695_p7, %p1689_p12 }
  0x3f   : > { %1699 = shalt.err (!%p1696_p0)
}
  0x40   : > { %s1700_s18 = scalar_lea.vmem %s1956_s5, 8192  ;;  %s1806_s22 = smov [#allocation6]  }
  0x41   : > { %p1701_p9 = scmp.ne.s32.totalorder %s1956_s5, %s1700_s18  ;;  %s1705_s23 = sshll.u32 %s1806_s22, 4  ;;  %s1706_s23 = int_to_ptr.vmem [resolvable:$false] %s1705_s23 }
  0x42   : > { %s1707_s30 = scalar_lea.vmem %s1706_s23, 16384  ;;  %p1708_p8 = scmp.lt.s32.totalorder %s1956_s5, %s1706_s23 }
  0x43   : > { %p1703_p4 = pnand %p1701_p9, %p1657_p2  ;;  %p1709_p1 = scmp.lt.s32.totalorder %s1707_s30, %s1700_s18 }
  0x45   : > { %p1704_p10 = pneg %p1703_p4  ;;  %p1710_p3 = por %p1709_p1, %p1708_p8 }
  0x47   : > { %p1711_p5 = pnand %p1710_p3, %p1704_p10 }
  0x49   : > { %1714 = shalt.err (!%p1711_p5)
}
  0x4a   : > { %s1807_s9 = smov 64   ;;  %s1808_s10 = smov 4  }
  0x4b   : > { %1516 = dma.hbm_to_vmem [thread:$0]  (!%p1902_p13), %s1954_s29, 8192, %s1956_s5, %s201_s7, %s1807_s9, %s1807_s9, %s1808_s10  }
  0x4c   : > { %226 = sbr.rel (%p1947_p11) target bundleno = 424 (0x1a8), region = 32  ;;  %s1987_s6 = sand.u32 (!%p1947_p11), 1, %s1785_s13  }
  0x4d   : > { %s1501_s8 = smul.u32 (!%p1947_p11), 96, %s1987_s6  ;;  %s229_s11 = scalar_lea.sflag (!%p1947_p11), [#allocation4], %s1987_s6 }
  0x4e   : > { %p2152_p8 = scmp.ne.s32.totalorder (!%p1947_p11), %s2146_s24, 0 }
  0x4f   : > { %s1991_s19 = scalar_lea.vmem (!%p1947_p11), [#allocation3], %s1501_s8 }
  0x53   : > { %1768 = dma.done.wait (%p2152_p8), %s229_s11, 1536  }
  0x54   : > { %1770 = vsyncadd (%p2152_p8), %s229_s11, 4294965760  ;;  %s1290_s28 = sshll.u32 %s1987_s6, 9  ;;  %s238_s4 = scalar_lea.sflag [#allocation7], %s1987_s6 }
  0x55   : > { %s1999_s21 = scalar_lea.vmem [#allocation6], %s1290_s28 }
  0x56   : > { %1772 = dma.done.wait (%p2152_p8), %s238_s4, 8192  }
  0x57   : > { %1774 = vsyncadd (%p2152_p8), %s238_s4, 4294959104  ;;  %v1577_v0 = vld [vmem:[%s1999_s21 + $0x40] sm:$0xff]   ;;  %v1581_v4 = vld [vmem:[%s1999_s21 + $0x48] sm:$0xff]   ;;  %s1502_s5 = smul.u32 12, %s1987_s6  ;;  %s1138_s10 = scalar_lea.sflag [#allocation5], %s1987_s6 }
  0x58   : > { %v1578_v1 = vld [vmem:[%s1999_s21 + $0xc0] sm:$0xff]   ;;  %1387 = vmatprep.subr.bf16.mxu0 %v1577_v0  ;;  %v1582_v5 = vld [vmem:[%s1999_s21 + $0xc8] sm:$0xff]   ;;  %v1585_v8 = vld [vmem:[%s1999_s21 + $0x50] sm:$0xff]   ;;  %s1503_s7 = smul.u32 192, %s1793_s15  ;;  %p2153_p2 = scmp.ne.s32.totalorder %s2147_s25, 0 }
  0x59   : > { %v1579_v2 = vld [vmem:[%s1999_s21] sm:$0xff]   ;;  %1415 = vmatprep.subr.bf16.mxu1 %v1578_v1  ;;  %v1583_v6 = vld [vmem:[%s1999_s21 + $0x8] sm:$0xff]   ;;  %v1586_v9 = vld [vmem:[%s1999_s21 + $0xd0] sm:$0xff]   ;;  %s271_s18 = scalar_lea.vmem [#allocation8], %s1502_s5  ;;  %s1809_s8 = smov [#allocation8]  }
  0x5a   : > { %v1580_v3 = vld [vmem:[%s1999_s21 + $0x80] sm:$0xff]   ;;  %1388 = vmatpush3.bf16.msra.mxu0 %v1579_v2  ;;  %v1584_v7 = vld [vmem:[%s1999_s21 + $0x88] sm:$0xff]   ;;  %v1587_v10 = vld [vmem:[%s1999_s21 + $0x10] sm:$0xff]   ;;  %s1152_s22 = sshll.u32 %s271_s18, 4  ;;  %s2089_s9 = scalar_lea.hbm %s2142_s3, %s1503_s7  ;;  %s2091_s22 = int_to_ptr.vmem [resolvable:$true] %s1152_s22 }
  0x5b   : > { %1416 = vmatpush3.bf16.msra.mxu1 %v1580_v3  ;;  %1389 = vmatprep.subr.bf16.mxu0 %v1581_v4  ;;  %v1588_v11 = vld [vmem:[%s1999_s21 + $0x90] sm:$0xff]   ;;  %v1589_v12 = vld [vmem:[%s1999_s21 + $0x58] sm:$0xff]   ;;  %v1593_v16 = vld [vmem:[%s1999_s21 + $0x60] sm:$0xff]   ;;  %s1715_s15 = scalar_lea.vmem %s2091_s22, 192  ;;  %s1719_s11 = sshll.u32 %s1809_s8, 4  ;;  %s1720_s11 = int_to_ptr.vmem [resolvable:$false] %s1719_s11 }
  0x5c   : > { %1417 = vmatprep.subr.bf16.mxu1 %v1582_v5  ;;  %v1590_v13 = vld [vmem:[%s1999_s21 + $0xd8] sm:$0xff]   ;;  %v1594_v17 = vld [vmem:[%s1999_s21 + $0xe0] sm:$0xff]   ;;  %v1597_v20 = vld [vmem:[%s1999_s21 + $0x68] sm:$0xff]   ;;  %p1716_p13 = scmp.ne.s32.totalorder %s2091_s22, %s1715_s15  ;;  %p1722_p6 = scmp.lt.s32.totalorder %s2091_s22, %s1720_s11 }
  0x5d   : > { %v1591_v14 = vld [vmem:[%s1999_s21 + $0x18] sm:$0xff]   ;;  %v1595_v18 = vld [vmem:[%s1999_s21 + $0x20] sm:$0xff]   ;;  %v1598_v21 = vld [vmem:[%s1999_s21 + $0xe8] sm:$0xff]  }
  0x5e   : > { %1390 = vmatpush3.bf16.msra.mxu0 %v1583_v6  ;;  %v1592_v15 = vld [vmem:[%s1999_s21 + $0x98] sm:$0xff]   ;;  %v1596_v19 = vld [vmem:[%s1999_s21 + $0xa0] sm:$0xff]   ;;  %v1599_v22 = vld [vmem:[%s1999_s21 + $0x28] sm:$0xff]   ;;  %p1717_p11 = pnand %p1716_p13, %p2153_p2 }
  0x5f   : > { %1418 = vmatpush3.bf16.msra.mxu1 %v1584_v7  ;;  %1391 = vmatprep.subr.bf16.mxu0 %v1585_v8  ;;  %v1600_v23 = vld [vmem:[%s1999_s21 + $0xa8] sm:$0xff]   ;;  %v1601_v24 = vld [vmem:[%s1999_s21 + $0x70] sm:$0xff]   ;;  %v1605_v28 = vld [vmem:[%s1999_s21 + $0x78] sm:$0xff]  }
  0x60   : > { %1419 = vmatprep.subr.bf16.mxu1 %v1586_v9  ;;  %v1602_v25 = vld [vmem:[%s1999_s21 + $0xf0] sm:$0xff]   ;;  %v1606_v29 = vld [vmem:[%s1999_s21 + $0xf8] sm:$0xff]   ;;  %v288_v32 = vld [vmem:[%s1991_s19] sm:$0xff]  ;;  %p1718_p12 = pneg %p1717_p11 }
  0x61   : > { %v1603_v26 = vld [vmem:[%s1999_s21 + $0x30] sm:$0xff]   ;;  %v1607_v30 = vld [vmem:[%s1999_s21 + $0x38] sm:$0xff]   ;;  %v292_v33 = vld [vmem:[%s1991_s19 + $0x20] sm:$0xff] }
  0x62   : > { %1392 = vmatpush3.bf16.msra.mxu0 %v1587_v10  ;;  %v1604_v27 = vld [vmem:[%s1999_s21 + $0xb0] sm:$0xff]   ;;  %v1608_v31 = vld [vmem:[%s1999_s21 + $0xb8] sm:$0xff]   ;;  %v289_v34 = vld [vmem:[%s1991_s19 + $0x8] sm:$0xff]  ;;  %v1291_v35 = vcombine.low %v288_v32, %v292_v33  ;;  %v1292_v36 = vcombine.high %v288_v32, %v292_v33 }
  0x63   : > { %1420 = vmatpush3.bf16.msra.mxu1 %v1588_v11  ;;  %1393 = vmatprep.subr.bf16.mxu0 %v1589_v12  ;;  %v293_v37 = vld [vmem:[%s1991_s19 + $0x28] sm:$0xff]  ;;  %v1609_v40 = vld [vmem:[%s1999_s21 + $0x140] sm:$0xff]   ;;  %v1617_v48 = vld [vmem:[%s1999_s21 + $0x150] sm:$0xff]  }
  0x64   : > { %1421 = vmatprep.subr.bf16.mxu1 %v1590_v13  ;;  %v1293_v38 = vcombine.low %v289_v34, %v293_v37  ;;  %v1294_v39 = vcombine.high %v289_v34, %v293_v37  ;;  %912 = vmatprep.mubr.bf16.mxu0 %v1292_v36  ;;  %v1610_v41 = vld [vmem:[%s1999_s21 + $0x1c0] sm:$0xff]   ;;  %v1613_v44 = vld [vmem:[%s1999_s21 + $0x148] sm:$0xff]   ;;  %v1618_v49 = vld [vmem:[%s1999_s21 + $0x1d0] sm:$0xff]  }
  0x65   : > { %v1611_v42 = vld [vmem:[%s1999_s21 + $0x100] sm:$0xff]   ;;  %v1614_v45 = vld [vmem:[%s1999_s21 + $0x1c8] sm:$0xff]   ;;  %v1619_v50 = vld [vmem:[%s1999_s21 + $0x110] sm:$0xff]  }
  0x66   : > { %1394 = vmatpush3.bf16.msra.mxu0 %v1591_v14  ;;  %960 = vmatprep.mubr.bf16.mxu1 %v1294_v39  ;;  %v1612_v43 = vld [vmem:[%s1999_s21 + $0x180] sm:$0xff]   ;;  %v1615_v46 = vld [vmem:[%s1999_s21 + $0x108] sm:$0xff]   ;;  %v1620_v51 = vld [vmem:[%s1999_s21 + $0x190] sm:$0xff]  }
  0x67   : > { %1422 = vmatpush3.bf16.msra.mxu1 %v1592_v15  ;;  %1395 = vmatprep.subr.bf16.mxu0 %v1593_v16  ;;  %v1616_v47 = vld [vmem:[%s1999_s21 + $0x188] sm:$0xff]   ;;  %v1621_v52 = vld [vmem:[%s1999_s21 + $0x158] sm:$0xff]   ;;  %v1625_v56 = vld [vmem:[%s1999_s21 + $0x160] sm:$0xff]  }
  0x68   : > { %1423 = vmatprep.subr.bf16.mxu1 %v1594_v17  ;;  %v1622_v53 = vld [vmem:[%s1999_s21 + $0x1d8] sm:$0xff]   ;;  %v1626_v57 = vld [vmem:[%s1999_s21 + $0x1e0] sm:$0xff]   ;;  %v1630_v62 = vld [vmem:[%s1999_s21 + $0x168] sm:$0xff]  }
  0x69   : > { %v1623_v54 = vld [vmem:[%s1999_s21 + $0x118] sm:$0xff]   ;;  %v1627_v58 = vld [vmem:[%s1999_s21 + $0x120] sm:$0xff]   ;;  %v1631_v0 = vld [vmem:[%s1999_s21 + $0x1e8] sm:$0xff]  }
  0x6a   : > { %1396 = vmatpush3.bf16.msra.mxu0 %v1595_v18  ;;  %v1624_v55 = vld [vmem:[%s1999_s21 + $0x198] sm:$0xff]   ;;  %v1628_v59 = vld [vmem:[%s1999_s21 + $0x1a0] sm:$0xff]   ;;  %v1633_v1 = vld [vmem:[%s1999_s21 + $0x128] sm:$0xff]  }
  0x6b   : > { %1424 = vmatpush3.bf16.msra.mxu1 %v1596_v19  ;;  %1397 = vmatprep.subr.bf16.mxu0 %v1597_v20  ;;  %v296_v60 = vld [vmem:[%s1991_s19 + $0x40] sm:$0xff]  ;;  %v1634_v2 = vld [vmem:[%s1999_s21 + $0x1a8] sm:$0xff]   ;;  %v1637_v6 = vld [vmem:[%s1999_s21 + $0x170] sm:$0xff]  }
  0x6c   : > { %1425 = vmatprep.subr.bf16.mxu1 %v1598_v21  ;;  %v1300_v61 = vcombine.high %v296_v60, %v296_v60  ;;  %v1299_v63 = vcombine.low %v296_v60, %v296_v60  ;;  %v297_v3 = vld [vmem:[%s1991_s19 + $0x48] sm:$0xff]  ;;  %v1638_v7 = vld [vmem:[%s1999_s21 + $0x1f0] sm:$0xff]   ;;  %v1641_v10 = vld [vmem:[%s1999_s21 + $0x178] sm:$0xff]  }
  0x6d   : > { %v1302_v4 = vcombine.high %v297_v3, %v297_v3  ;;  %v1301_v5 = vcombine.low %v297_v3, %v297_v3  ;;  %v1639_v8 = vld [vmem:[%s1999_s21 + $0x130] sm:$0xff]   ;;  %v1642_v11 = vld [vmem:[%s1999_s21 + $0x1f8] sm:$0xff]  }
  0x6e   : > { %1398 = vmatpush3.bf16.msra.mxu0 %v1599_v22  ;;  %v1640_v9 = vld [vmem:[%s1999_s21 + $0x1b0] sm:$0xff]   ;;  %v1643_v12 = vld [vmem:[%s1999_s21 + $0x138] sm:$0xff]  }
  0x6f   : > { %1426 = vmatpush3.bf16.msra.mxu1 %v1600_v23  ;;  %1399 = vmatprep.subr.bf16.mxu0 %v1601_v24  ;;  %v1644_v13 = vld [vmem:[%s1999_s21 + $0x1b8] sm:$0xff]   ;;  %v290_v14 = vld [vmem:[%s1991_s19 + $0x10] sm:$0xff] }
  0x70   : > { %1427 = vmatprep.subr.bf16.mxu1 %v1602_v25  ;;  %v294_v15 = vld [vmem:[%s1991_s19 + $0x30] sm:$0xff]  ;;  %v291_v16 = vld [vmem:[%s1991_s19 + $0x18] sm:$0xff] }
  0x71   : > { %v1295_v17 = vcombine.low %v290_v14, %v294_v15  ;;  %v1296_v18 = vcombine.high %v290_v14, %v294_v15  ;;  %v295_v19 = vld [vmem:[%s1991_s19 + $0x38] sm:$0xff]  ;;  %v298_v20 = vld [vmem:[%s1991_s19 + $0x50] sm:$0xff] }
  0x72   : > { %1400 = vmatpush3.bf16.msra.mxu0 %v1603_v26  ;;  %v299_v21 = vld [vmem:[%s1991_s19 + $0x58] sm:$0xff]  ;;  %v1297_v22 = vcombine.low %v291_v16, %v295_v19  ;;  %v1298_v23 = vcombine.high %v291_v16, %v295_v19  ;;  %v1304_v24 = vcombine.high %v298_v20, %v298_v20  ;;  %v1303_v26 = vcombine.low %v298_v20, %v298_v20  ;;  %s1721_s19 = scalar_lea.vmem %s1720_s11, 384 }
  0x73   : > { %1428 = vmatpush3.bf16.msra.mxu1 %v1604_v27  ;;  %1401 = vmatprep.subr.bf16.mxu0 %v1605_v28  ;;  %v1306_v25 = vcombine.high %v299_v21, %v299_v21  ;;  %v1305_v27 = vcombine.low %v299_v21, %v299_v21  ;;  %p1723_p7 = scmp.lt.s32.totalorder %s1721_s19, %s1715_s15 }
  0x74   : > { %1429 = vmatprep.subr.bf16.mxu1 %v1606_v29 }
  0x75   : > { %p1724_p0 = por %p1723_p7, %p1722_p6 }
  0x76   : > { %1402 = vmatpush3.bf16.msra.mxu0 %v1607_v30 }
  0x77   : > { %1430 = vmatpush3.bf16.msra.mxu1 %v1608_v31  ;;  %1443 = vmatprep.subr.bf16.mxu0 %v1609_v40  ;;  %p1725_p9 = pnand %p1724_p0, %p1718_p12 }
  0x78   : > { %1471 = vmatprep.subr.bf16.mxu1 %v1610_v41 }
  0x79   : > { %913 = vmatmul.mubr.bf16.vlgmr.msra.gmra.mrb[0].mxu0 %v1291_v35 }
  0x7a   : > { %961 = vmatmul.mubr.bf16.vlgmr.msra.gmra.mrb[0].mxu1 %v1293_v38  ;;  %1444 = vmatpush3.bf16.msra.mxu0 %v1611_v42 }
  0x7b   : > { %1472 = vmatpush3.bf16.msra.mxu1 %v1612_v43  ;;  %1445 = vmatprep.subr.bf16.mxu0 %v1613_v44 }
  0x7c   : > { %1473 = vmatprep.subr.bf16.mxu1 %v1614_v45  ;;  %920 = vmatprep.mubr.bf16.mxu0 %v1300_v61 }
  0x7d   : > { %968 = vmatprep.mubr.bf16.mxu1 %v1302_v4 }
  0x7e   : > { %1446 = vmatpush3.bf16.msra.mxu0 %v1615_v46 }
  0x7f   : > { %1474 = vmatpush3.bf16.msra.mxu1 %v1616_v47  ;;  %1447 = vmatprep.subr.bf16.mxu0 %v1617_v48 }
  0x80   : > { %1475 = vmatprep.subr.bf16.mxu1 %v1618_v49 }
  0x81   : > { %921 = vmatmul.mubr.bf16.gmra.mrb[4].mxu0 %v1299_v63 }
  0x82   : > { %1448 = vmatpush3.bf16.msra.mxu0 %v1619_v50  ;;  %969 = vmatmul.mubr.bf16.gmra.mrb[4].mxu1 %v1301_v5 }
  0x83   : > { %1476 = vmatpush3.bf16.msra.mxu1 %v1620_v51  ;;  %1449 = vmatprep.subr.bf16.mxu0 %v1621_v52 }
  0x84   : > { %1477 = vmatprep.subr.bf16.mxu1 %v1622_v53  ;;  %1008 = vmatprep.mubr.bf16.mxu0 %v1296_v18 }
  0x85   : > { %1056 = vmatprep.mubr.bf16.mxu1 %v1298_v23 }
  0x86   : > { %1450 = vmatpush3.bf16.msra.mxu0 %v1623_v54 }
  0x87   : > { %1478 = vmatpush3.bf16.msra.mxu1 %v1624_v55  ;;  %1451 = vmatprep.subr.bf16.mxu0 %v1625_v56 }
  0x88   : > { %1479 = vmatprep.subr.bf16.mxu1 %v1626_v57 }
  0x8a   : > { %1452 = vmatpush3.bf16.msra.mxu0 %v1627_v58 }
  0x8b   : > { %1480 = vmatpush3.bf16.msra.mxu1 %v1628_v59  ;;  %1453 = vmatprep.subr.bf16.mxu0 %v1630_v62 }
  0x8c   : > { %1481 = vmatprep.subr.bf16.mxu1 %v1631_v0 }
  0x8e   : > { %1454 = vmatpush3.bf16.msra.mxu0 %v1633_v1  ;;  %v1371_v1 = vld [vmem:[%s2141_s2] ss:$0 sm:$0xff] }
  0x8f   : > { %1482 = vmatpush3.bf16.msra.mxu1 %v1634_v2  ;;  %1455 = vmatprep.subr.bf16.mxu0 %v1637_v6 }
  0x90   : > { %1483 = vmatprep.subr.bf16.mxu1 %v1638_v7 }
  0x92   : > { %1456 = vmatpush3.bf16.msra.mxu0 %v1639_v8 }
  0x93   : > { %1484 = vmatpush3.bf16.msra.mxu1 %v1640_v9  ;;  %1457 = vmatprep.subr.bf16.mxu0 %v1641_v10 }
  0x94   : > { %1485 = vmatprep.subr.bf16.mxu1 %v1642_v11 }
  0x96   : > { %1458 = vmatpush3.bf16.msra.mxu0 %v1643_v12 }
  0x97   : > { %1486 = vmatpush3.bf16.msra.mxu1 %v1644_v13 }
  0x99   : > { %1009 = vmatmul.mubr.bf16.vlgmr.msra.gmra.mrb[8].mxu0 %v1295_v17 }
  0x9a   : > { %1057 = vmatmul.mubr.bf16.vlgmr.msra.gmra.mrb[8].mxu1 %v1297_v22  ;;  %1016 = vmatprep.mubr.bf16.mxu0 %v1304_v24 }
  0x9b   : > { %1064 = vmatprep.mubr.bf16.mxu1 %v1306_v25 }
  0xa1   : > { %1017 = vmatmul.mubr.bf16.gmra.mrb[12].mxu0 %v1303_v26 }
  0xa2   : > { %1065 = vmatmul.mubr.bf16.gmra.mrb[12].mxu1 %v1305_v27 }
 0x14c   : > { %v1403_v28 = vpop.f32.mrb[0].mxu0 }
 0x14d   : > { %v1431_v29 = vpop.f32.mrb[0].mxu1  ;;  %v1404_v30 = vpop.f32.mrb[1].mxu0 }
 0x14e   : > { %v1405_v31 = vadd.f32 %v1404_v30, %v1403_v28  ;;  %v1432_v32 = vpop.f32.mrb[1].mxu1  ;;  %v1406_v33 = vpop.f32.mrb[2].mxu0 }
 0x14f   : > { %v1433_v34 = vadd.f32 %v1432_v32, %v1431_v29  ;;  %v1434_v35 = vpop.f32.mrb[2].mxu1  ;;  %v1407_v36 = vpop.f32.mrb[3].mxu0 }
 0x150   : > { %v1408_v37 = vadd.f32 %v1407_v36, %v1406_v33  ;;  %v1435_v38 = vpop.f32.mrb[3].mxu1 }
 0x151   : > { %v963_v39 = vadd.f32 %v1433_v34, %v1405_v31  ;;  %v1436_v40 = vadd.f32 %v1435_v38, %v1434_v35 }
 0x153   : > { %v966_v41 = vadd.f32 %v1436_v40, %v1408_v37 }
 0x154   : > { %v1409_v42 = vpop.f32.mrb[4].mxu0 }
 0x155   : > { %v1410_v43 = vpop.f32.mrb[5].mxu0  ;;  %v1437_v47 = vpop.f32.mrb[4].mxu1 }
 0x156   : > { %v1411_v44 = vadd.f32 %v1410_v43, %v1409_v42  ;;  %v1412_v45 = vpop.f32.mrb[6].mxu0  ;;  %v1438_v48 = vpop.f32.mrb[5].mxu1 }
 0x157   : > { %v1413_v46 = vpop.f32.mrb[7].mxu0  ;;  %v1439_v49 = vadd.f32 %v1438_v48, %v1437_v47  ;;  %v1440_v50 = vpop.f32.mrb[6].mxu1 }
 0x158   : > { %v1441_v51 = vpop.f32.mrb[7].mxu1 }
 0x159   : > { %v971_v52 = vadd.f32 %v1439_v49, %v1411_v44 }
 0x16c   : > { %v1459_v53 = vpop.f32.mrb[8].mxu0 }
 0x16d   : > { %v1487_v54 = vpop.f32.mrb[8].mxu1  ;;  %v1460_v55 = vpop.f32.mrb[9].mxu0 }
 0x16e   : > { %v1461_v56 = vadd.f32 %v1460_v55, %v1459_v53  ;;  %v1488_v57 = vpop.f32.mrb[9].mxu1  ;;  %v1462_v58 = vpop.f32.mrb[10].mxu0 }
 0x16f   : > { %v1489_v59 = vadd.f32 %v1488_v57, %v1487_v54  ;;  %v1490_v60 = vpop.f32.mrb[10].mxu1  ;;  %v1463_v61 = vpop.f32.mrb[11].mxu0 }
 0x170   : > { %v1011_v62 = vadd.f32 %v1461_v56, %v963_v39  ;;  %v1464_v63 = vadd.f32 %v1463_v61, %v1462_v58  ;;  %v1491_v0 = vpop.f32.mrb[11].mxu1 }
 0x171   : > { %v1492_v2 = vadd.f32 %v1491_v0, %v1490_v60 }
 0x172   : > { %v1059_v3 = vadd.f32 %v1489_v59, %v1011_v62  ;;  %v1014_v4 = vadd.f32 %v1464_v63, %v966_v41 }
 0x174   : > { %v1091_v5 = vadd.f32 %v1371_v1, %v1059_v3  ;;  %v1062_v6 = vadd.f32 %v1492_v2, %v1014_v4  ;;  %v1465_v7 = vpop.f32.mrb[12].mxu0 }
 0x175   : > { %v1493_v8 = vpop.f32.mrb[12].mxu1  ;;  %v1466_v9 = vpop.f32.mrb[13].mxu0 }
 0x176   : > { %v1097_v10 = vmul.f32 0.044715, %v1091_v5  ;;  %v1092_v11 = vadd.f32 %v1371_v1, %v1062_v6  ;;  %v1467_v12 = vadd.f32 %v1466_v9, %v1465_v7  ;;  %v1494_v13 = vpop.f32.mrb[13].mxu1  ;;  %v1468_v14 = vpop.f32.mrb[14].mxu0  ;;  %v1094_v39 = vmul.f32 0.5, %v1091_v5 }
 0x177   : > { %v1495_v15 = vadd.f32 %v1494_v13, %v1493_v8  ;;  %v1496_v16 = vpop.f32.mrb[14].mxu1  ;;  %v1469_v17 = vpop.f32.mrb[15].mxu0 }
 0x178   : > { %v1100_v18 = vmul.f32 %v1097_v10, %v1091_v5  ;;  %v1098_v19 = vmul.f32 0.044715, %v1092_v11  ;;  %v1019_v20 = vadd.f32 %v1467_v12, %v971_v52  ;;  %v1497_v21 = vpop.f32.mrb[15].mxu1  ;;  %v1095_v40 = vmul.f32 0.5, %v1092_v11 }
 0x17a   : > { %v1103_v22 = vmul.f32 %v1100_v18, %v1091_v5  ;;  %v1101_v23 = vmul.f32 %v1098_v19, %v1092_v11  ;;  %v1067_v24 = vadd.f32 %v1495_v15, %v1019_v20 }
 0x17c   : > { %v1106_v25 = vadd.f32 %v1103_v22, %v1091_v5  ;;  %v1104_v26 = vmul.f32 %v1101_v23, %v1092_v11  ;;  %v1093_v27 = vadd.f32 %v1371_v1, %v1067_v24 }
 0x17e   : > { %v1109_v28 = vmul.f32 0.7978846, %v1106_v25  ;;  %v1107_v29 = vadd.f32 %v1104_v26, %v1092_v11  ;;  %v1099_v30 = vmul.f32 0.044715, %v1093_v27  ;;  %v1096_v46 = vmul.f32 0.5, %v1093_v27 }
 0x180   : > { %1649 = vtanh.f32 %v1109_v28  ;;  %v1110_v31 = vmul.f32 0.7978846, %v1107_v29  ;;  %v1102_v32 = vmul.f32 %v1099_v30, %v1093_v27 }
 0x182   : > { %1651 = vtanh.f32 %v1110_v31  ;;  %v1105_v33 = vmul.f32 %v1102_v32, %v1093_v27 }
 0x184   : > { %v1108_v34 = vadd.f32 %v1105_v33, %v1093_v27 }
 0x186   : > { %v1111_v35 = vmul.f32 0.7978846, %v1108_v34 }
 0x188   : > { %1653 = vtanh.f32 %v1111_v35 }
 0x18a   : > { %v1650_v36 = vpop.eup %1649 }
 0x18b   : > { %v1115_v37 = vadd.f32 1.0, %v1650_v36 }
 0x18c   : > { %v1652_v38 = vpop.eup %1651 }
 0x18d   : > { %v1116_v41 = vadd.f32 1.0, %v1652_v38  ;;  %v1118_v42 = vmul.f32 %v1115_v37, %v1094_v39 }
 0x18f   : > { %v1119_v43 = vmul.f32 %v1116_v41, %v1095_v40 }
 0x191   : > { %v1385_v44 = vpack.c.bf16 %v1119_v43, %v1118_v42 }
 0x192   : > { %v1654_v45 = vpop.eup %1653 }
 0x193   : > { %v1117_v47 = vadd.f32 1.0, %v1654_v45  ;;  %1386 = vst [vmem:[%s271_s18] sm:$0xff] %v1385_v44  }
 0x195   : > { %v1120_v48 = vmul.f32 %v1117_v47, %v1096_v46 }
 0x197   : > { %v1381_v49 = vpack.c.bf16 %v1120_v48, %v1120_v48 }
 0x199   : > { %1136 = vst [vmem:[%s271_s18 + $0x8] sm:$0xf] %v1381_v49 }
 0x19a   : > { %1728 = shalt.err (!%p1725_p9)
}
 0x19b   : > { %s1729_s28 = scalar_lea.hbm %s2089_s9, 192  ;;  %s1733_s24 = scalar_lea.hbm %s2142_s3, 768 }
 0x19c   : > { %p1730_p4 = scmp.ne.s32.totalorder %s2089_s9, %s1729_s28  ;;  %p1734_p3 = scmp.lt.u32.totalorder %s2089_s9, %s2142_s3 }
 0x19d   : > { %p1735_p5 = scmp.lt.u32.totalorder %s1733_s24, %s1729_s28  ;;  %p1737_p13 = scmp.lt.u32.totalorder %s1729_s28, %s2089_s9 }
 0x19e   : > { %p1731_p10 = pnand %p1730_p4, %p2153_p2 }
 0x19f   : > { %p1736_p8 = por %p1735_p5, %p1734_p3 }
 0x1a0   : > { %p1732_p1 = pneg %p1731_p10 }
 0x1a1   : > { %p1738_p11 = por %p1737_p13, %p1736_p8 }
 0x1a3   : > { %p1739_p12 = pnand %p1738_p11, %p1732_p1 }
 0x1a5   : > { %1742 = shalt.err (!%p1739_p12)
}
 0x1a6   : > { %s1810_s7 = smov 64   ;;  %s1811_s18 = smov 4  }
 0x1a7   : > { %1508 = dma.vmem_to_hbm [thread:$0]  (%p2153_p2), %s2091_s22, 192, %s2089_s9, %s1138_s10, %s1810_s7, %s1810_s7, %s1811_s18  }
 0x1a8 PF: > { %p1522_p6 = scmp.ge.s32.totalorder %s1801_s17, 2  ;;  %s1167_s23 = sand.u32 1, %s1781_s12  }
 0x1a9   : > { %p2154_p7 = scmp.ne.s32.totalorder %s2148_s27, 0  ;;  %s1168_s30 = scalar_lea.sflag [#allocation5], %s1167_s23 }
 0x1ab   : > { %p1518_p0 = pnand %p1522_p6, %p2154_p7 }
 0x1ad   : > { %1776 = dma.done.wait (!%p1518_p0), %s1168_s30, 192  }
 0x1ae   : > { %1778 = vsyncadd (!%p1518_p0), %s1168_s30, 4294967104  ;;  %s22_s17 = sadd.s32 1, %s1801_s17   ;;  %s2155_s12 = smov %s1785_s13 }
 0x1af   : > { %p19_p9 = scmp.ge.s32.totalorder %s22_s17, 6   ;;  %s2156_s13 = smov %s1789_s14 }
 0x1b0   : > { %s2157_s14 = smov %s1888_s26  ;;  %s2158_s15 = smov %s1797_s16 }
 0x1b1   : > { %s2159_s16 = smov %s2161_s20  ;;  %21 = sbr.rel (!%p19_p9) target bundleno = 8 (0x8), region = 101 }
 0x1b8   :  { %1173 = vsyncpa [#allocation4], 1 }
 0x1b9   :  { %1175 = vsyncpa [#allocation4 + $0x1], 1 }
 0x1ba   :  { %1176 = vsyncpa [#allocation7], 1 }
 0x1bb   :  { %1178 = vsyncpa [#allocation7 + $0x1], 1 }
 0x1bc   :  { %1179 = vsyncpa [#allocation5], 1 }
 0x1bd   :  { %1181 = vsyncpa [#allocation5 + $0x1], 1 }

</bundles_post_ra>
